<compile_context>
chip_gen: v7x
topology: tpu7x:2x2x1
jax: 0.10.0
libtpu: 0.0.40
codegen_flags: <defaults>
</compile_context>

<pallas_src>
import functools

import jax
import jax.numpy as jnp
from jax import lax
from jax.experimental import pallas as pl
from jax.experimental.pallas import tpu as pltpu

LN_EPS = 1e-5  # nn.LayerNorm default


def _round_up(a, m):
    return (a + m - 1) // m * m


def _nbytes(a):
    return a.size * a.dtype.itemsize


def _pad2d(a, shape, dtype):
    """Place `a` (cast to dtype) in the top-left of a zeros array of `shape`."""
    a = a.astype(dtype)
    if a.shape == shape:
        return a
    return jnp.zeros(shape, dtype).at[: a.shape[0], : a.shape[1]].set(a)


def _mlp_kernel(x_ref, g_ref, beta_ref, w1_ref, b1_ref, w2_ref, b2_ref, o_ref,
                *, e_real: int):
    # ---- LayerNorm over the (possibly lane-padded) embed dim, in f32 ----
    x = x_ref[...].astype(jnp.float32)                    # (tm, Ep)
    ep = x.shape[-1]
    if e_real == ep:
        mean = jnp.mean(x, axis=-1, keepdims=True)
        centered = x - mean
        var = jnp.mean(centered * centered, axis=-1, keepdims=True)
    else:
        # Padded lanes hold zeros; mask them out of the statistics.
        lane = lax.broadcasted_iota(jnp.int32, x.shape, dimension=1)
        mask = (lane < e_real).astype(jnp.float32)
        inv_e = jnp.float32(1.0 / e_real)
        mean = jnp.sum(x, axis=-1, keepdims=True) * inv_e     # zeros add nothing
        centered = (x - mean) * mask
        var = jnp.sum(centered * centered, axis=-1, keepdims=True) * inv_e
    xn = centered * lax.rsqrt(var + jnp.float32(LN_EPS))
    xn = xn * g_ref[...] + beta_ref[...]                  # (tm, Ep), f32

    # ---- fc1 on the MXU: bf16 operands, f32 accumulation ----
    h = jnp.dot(xn.astype(w1_ref.dtype), w1_ref[...],
                preferred_element_type=jnp.float32) + b1_ref[...]

    # ---- GELU (exact erf form == nn.GELU default), f32 ----
    # TODO(synk): if profiling shows the VALU slot saturated (v6e), switch to the
    # tanh approximation so the transcendental runs on the EUP (changes numerics).
    h = 0.5 * h * (1.0 + lax.erf(h * jnp.float32(0.7071067811865476)))

    # ---- fc2 on the MXU: bf16 operands, f32 accumulation ----
    out = jnp.dot(h.astype(w2_ref.dtype), w2_ref[...],
                  preferred_element_type=jnp.float32) + b2_ref[...]
    o_ref[...] = out.astype(o_ref.dtype)


def mlp_pallas(x, gamma, beta, w1, b1, w2, b2, *, tm=512,
               compute_dtype=jnp.bfloat16):
    """x: (B, S, E).  w1: (E, H), w2: (H, E).  Returns (B, S, E)."""
    B, S, E = x.shape
    H = w1.shape[1]
    rows = B * S

    # Lane dims padded to multiples of 128; row dim padded to the row tile.
    Ep = _round_up(E, 128)
    Hp = _round_up(H, 128)
    tm = _round_up(max(8, min(tm, rows)), 8)
    rows_p = _round_up(rows, tm)

    x2 = _pad2d(x.reshape(rows, E), (rows_p, Ep), x.dtype)
    g2 = _pad2d(gamma.reshape(1, E), (1, Ep), jnp.float32)
    be2 = _pad2d(beta.reshape(1, E), (1, Ep), jnp.float32)
    w1p = _pad2d(w1, (Ep, Hp), compute_dtype)
    b1p = _pad2d(b1.reshape(1, H), (1, Hp), jnp.float32)
    w2p = _pad2d(w2, (Hp, Ep), compute_dtype)
    b2p = _pad2d(b2.reshape(1, E), (1, Ep), jnp.float32)

    grid = (rows_p // tm,)

    # VMEM budget: double-buffered x/out tiles + resident constants (counted at
    # 2x for the pipeline's default double-buffering) + in-kernel f32 temps.
    tile_io = 2 * (tm * Ep * x2.dtype.itemsize) * 2                  # x + out
    consts = 2 * (_nbytes(w1p) + _nbytes(w2p) + _nbytes(b1p)
                  + _nbytes(b2p) + _nbytes(g2) + _nbytes(be2))
    temps = tm * Hp * 4 + 3 * tm * Ep * 4                            # h + LN/xn
    vmem_limit = int(min(max(tile_io + consts + temps + (8 << 20), 32 << 20),
                         64 << 20))

    kernel = functools.partial(_mlp_kernel, e_real=E)

    out2 = pl.pallas_call(
        kernel,
        out_shape=jax.ShapeDtypeStruct((rows_p, Ep), x.dtype),
        grid_spec=pltpu.PrefetchScalarGridSpec(
            num_scalar_prefetch=0,
            grid=grid,
            in_specs=[
                pl.BlockSpec((tm, Ep), lambda i: (i, 0)),   # x rows (tiled)
                pl.BlockSpec((1, Ep), lambda i: (0, 0)),    # layernorm gamma
                pl.BlockSpec((1, Ep), lambda i: (0, 0)),    # layernorm beta
                pl.BlockSpec((Ep, Hp), lambda i: (0, 0)),   # fc1 weight (E,H)
                pl.BlockSpec((1, Hp), lambda i: (0, 0)),    # fc1 bias
                pl.BlockSpec((Hp, Ep), lambda i: (0, 0)),   # fc2 weight (H,E)
                pl.BlockSpec((1, Ep), lambda i: (0, 0)),    # fc2 bias
            ],
            out_specs=pl.BlockSpec((tm, Ep), lambda i: (i, 0)),
        ),
        compiler_params=pltpu.CompilerParams(
            dimension_semantics=("parallel",),
            vmem_limit_bytes=vmem_limit),
    )(x2, g2, be2, w1p, b1p, w2p, b2p)

    return out2[:rows, :E].reshape(B, S, E)


def mlp_ref(x, gamma, beta, w1, b1, w2, b2):
    """Pure-JAX f32 reference mirroring the PyTorch module."""
    mean = jnp.mean(x, axis=-1, keepdims=True)
    var = jnp.mean((x - mean) ** 2, axis=-1, keepdims=True)
    xn = (x - mean) / jnp.sqrt(var + LN_EPS) * gamma + beta
    h = xn @ w1 + b1
    h = 0.5 * h * (1.0 + lax.erf(h / jnp.sqrt(2.0)))
    return h @ w2 + b2


if __name__ == "__main__":
    # Small shapes consistent with the module: tokens of embedding_dim with mlp_dim hidden.
    B, S, E, Hdim = 2, 8, 32, 64

    key = jax.random.PRNGKey(0)
    kx, kg, kb, kw1, kb1, kw2, kb2 = jax.random.split(key, 7)

    x = jax.random.normal(kx, (B, S, E), dtype=jnp.float32)

    # Deterministic synthetic parameters (shapes from the module's __init__).
    gamma = 1.0 + 0.02 * jax.random.normal(kg, (E,), dtype=jnp.float32)
    beta = 0.02 * jax.random.normal(kb, (E,), dtype=jnp.float32)
    w1 = jax.random.normal(kw1, (E, Hdim), dtype=jnp.float32) / jnp.sqrt(jnp.float32(E))
    b1 = 0.02 * jax.random.normal(kb1, (Hdim,), dtype=jnp.float32)
    w2 = jax.random.normal(kw2, (Hdim, E), dtype=jnp.float32) / jnp.sqrt(jnp.float32(Hdim))
    b2 = 0.02 * jax.random.normal(kb2, (E,), dtype=jnp.float32)

    out = mlp_pallas(x, gamma, beta, w1, b1, w2, b2)
    out = jax.block_until_ready(out)

    ref = mlp_ref(x, gamma, beta, w1, b1, w2, b2)
    assert out.shape == (B, S, E)
    # bf16 matmul operands (f32 accumulate) -> relaxed tolerance vs f32 reference.
    assert jnp.allclose(out, ref, atol=2e-2, rtol=2e-2), "mismatch vs reference"

    print("KERNEL_OK")
</pallas_src>

<mosaic_0001>
module attributes {stable_mosaic.version = 11 : i64} {
  func.func @_mlp_kernel(%arg0: i32, %arg1: memref<16x128xf32, #tpu.memory_space<vmem>>, %arg2: memref<1x128xf32, #tpu.memory_space<vmem>>, %arg3: memref<1x128xf32, #tpu.memory_space<vmem>>, %arg4: memref<128x128xbf16, #tpu.memory_space<vmem>>, %arg5: memref<1x128xf32, #tpu.memory_space<vmem>>, %arg6: memref<128x128xbf16, #tpu.memory_space<vmem>>, %arg7: memref<1x128xf32, #tpu.memory_space<vmem>>, %arg8: memref<16x128xf32, #tpu.memory_space<vmem>>) attributes {dimension_semantics = [#tpu.dimension_semantics<parallel>], iteration_bounds = array<i64: 1>, scalar_prefetch = 0 : i64, scratch_operands = 0 : i64, tpu.core_type = #tpu.core_type<tc>, window_params = [{transform_indices = @transform_0, window_bounds = array<i64: 16, 128>}, {pipeline_mode = #tpu.pipeline_mode<synchronous>, transform_indices = @transform_1, window_bounds = array<i64: 1, 128>}, {pipeline_mode = #tpu.pipeline_mode<synchronous>, transform_indices = @transform_2, window_bounds = array<i64: 1, 128>}, {pipeline_mode = #tpu.pipeline_mode<synchronous>, transform_indices = @transform_3, window_bounds = array<i64: 128, 128>}, {pipeline_mode = #tpu.pipeline_mode<synchronous>, transform_indices = @transform_4, window_bounds = array<i64: 1, 128>}, {pipeline_mode = #tpu.pipeline_mode<synchronous>, transform_indices = @transform_5, window_bounds = array<i64: 128, 128>}, {pipeline_mode = #tpu.pipeline_mode<synchronous>, transform_indices = @transform_6, window_bounds = array<i64: 1, 128>}, {transform_indices = @transform_7, window_bounds = array<i64: 16, 128>}]} {
    %c0 = arith.constant 0 : index
    %c0_0 = arith.constant 0 : index
    %0 = vector.load %arg1[%c0, %c0_0] : memref<16x128xf32, #tpu.memory_space<vmem>>, vector<16x128xf32>
    %1 = tpu.iota {dimensions = array<i32: 1>} : vector<16x128xi32>
    %c32_i32 = arith.constant 32 : i32
    %2 = vector.broadcast %c32_i32 : i32 to vector<16x128xi32>
    %3 = arith.cmpi slt, %1, %2 : vector<16x128xi32>
    %4 = arith.extui %3 : vector<16x128xi1> to vector<16x128xi32>
    %5 = arith.sitofp %4 : vector<16x128xi32> to vector<16x128xf32>
    %cst = arith.constant dense<0.000000e+00> : vector<16xf32>
    %6 = vector.multi_reduction <add>, %0, %cst [1] : vector<16x128xf32> to vector<16xf32>
    %7 = vector.shape_cast %6 : vector<16xf32> to vector<16x1xf32>
    %cst_1 = arith.constant 3.125000e-02 : f32
    %8 = vector.broadcast %cst_1 : f32 to vector<16x1xf32>
    %9 = arith.mulf %7, %8 : vector<16x1xf32>
    %10 = vector.broadcast %9 : vector<16x1xf32> to vector<16x128xf32>
    %11 = arith.subf %0, %10 : vector<16x128xf32>
    %12 = arith.mulf %11, %5 : vector<16x128xf32>
    %13 = arith.mulf %12, %12 : vector<16x128xf32>
    %cst_2 = arith.constant dense<0.000000e+00> : vector<16xf32>
    %14 = vector.multi_reduction <add>, %13, %cst_2 [1] : vector<16x128xf32> to vector<16xf32>
    %15 = vector.shape_cast %14 : vector<16xf32> to vector<16x1xf32>
    %cst_3 = arith.constant 3.125000e-02 : f32
    %16 = vector.broadcast %cst_3 : f32 to vector<16x1xf32>
    %17 = arith.mulf %15, %16 : vector<16x1xf32>
    %cst_4 = arith.constant 9.99999974E-6 : f32
    %18 = vector.broadcast %cst_4 : f32 to vector<16x1xf32>
    %19 = arith.addf %17, %18 : vector<16x1xf32>
    %20 = math.rsqrt %19 : vector<16x1xf32>
    %21 = vector.broadcast %20 : vector<16x1xf32> to vector<16x128xf32>
    %22 = arith.mulf %12, %21 : vector<16x128xf32>
    %c0_5 = arith.constant 0 : index
    %c0_6 = arith.constant 0 : index
    %23 = vector.load %arg2[%c0_5, %c0_6] : memref<1x128xf32, #tpu.memory_space<vmem>>, vector<1x128xf32>
    %24 = vector.broadcast %23 : vector<1x128xf32> to vector<16x128xf32>
    %25 = arith.mulf %22, %24 : vector<16x128xf32>
    %c0_7 = arith.constant 0 : index
    %c0_8 = arith.constant 0 : index
    %26 = vector.load %arg3[%c0_7, %c0_8] : memref<1x128xf32, #tpu.memory_space<vmem>>, vector<1x128xf32>
    %27 = vector.broadcast %26 : vector<1x128xf32> to vector<16x128xf32>
    %28 = arith.addf %25, %27 : vector<16x128xf32>
    %29 = arith.truncf %28 : vector<16x128xf32> to vector<16x128xbf16>
    %c0_9 = arith.constant 0 : index
    %c0_10 = arith.constant 0 : index
    %30 = vector.load %arg4[%c0_9, %c0_10] : memref<128x128xbf16, #tpu.memory_space<vmem>>, vector<128x128xbf16>
    %cst_11 = arith.constant dense<0.000000e+00> : vector<16x128xf32>
    %31 = tpu.matmul %29, %30, %cst_11 {dimension_numbers = #tpu.dot_dimension_numbers<[1], [0], [0], [1], [0, 0, 1, 1], [], []>} : vector<16x128xbf16>, vector<128x128xbf16>, vector<16x128xf32> -> vector<16x128xf32>
    %c0_12 = arith.constant 0 : index
    %c0_13 = arith.constant 0 : index
    %32 = vector.load %arg5[%c0_12, %c0_13] : memref<1x128xf32, #tpu.memory_space<vmem>>, vector<1x128xf32>
    %33 = vector.broadcast %32 : vector<1x128xf32> to vector<16x128xf32>
    %34 = arith.addf %31, %33 : vector<16x128xf32>
    %cst_14 = arith.constant 5.000000e-01 : f32
    %35 = vector.broadcast %cst_14 : f32 to vector<16x128xf32>
    %36 = arith.mulf %35, %34 : vector<16x128xf32>
    %cst_15 = arith.constant 0.707106769 : f32
    %37 = vector.broadcast %cst_15 : f32 to vector<16x128xf32>
    %38 = arith.mulf %34, %37 : vector<16x128xf32>
    %39 = math.erf %38 : vector<16x128xf32>
    %cst_16 = arith.constant 1.000000e+00 : f32
    %40 = vector.broadcast %cst_16 : f32 to vector<16x128xf32>
    %41 = arith.addf %40, %39 : vector<16x128xf32>
    %42 = arith.mulf %36, %41 : vector<16x128xf32>
    %43 = arith.truncf %42 : vector<16x128xf32> to vector<16x128xbf16>
    %c0_17 = arith.constant 0 : index
    %c0_18 = arith.constant 0 : index
    %44 = vector.load %arg6[%c0_17, %c0_18] : memref<128x128xbf16, #tpu.memory_space<vmem>>, vector<128x128xbf16>
    %cst_19 = arith.constant dense<0.000000e+00> : vector<16x128xf32>
    %45 = tpu.matmul %43, %44, %cst_19 {dimension_numbers = #tpu.dot_dimension_numbers<[1], [0], [0], [1], [0, 0, 1, 1], [], []>} : vector<16x128xbf16>, vector<128x128xbf16>, vector<16x128xf32> -> vector<16x128xf32>
    %c0_20 = arith.constant 0 : index
    %c0_21 = arith.constant 0 : index
    %46 = vector.load %arg7[%c0_20, %c0_21] : memref<1x128xf32, #tpu.memory_space<vmem>>, vector<1x128xf32>
    %47 = vector.broadcast %46 : vector<1x128xf32> to vector<16x128xf32>
    %48 = arith.addf %45, %47 : vector<16x128xf32>
    %c0_22 = arith.constant 0 : index
    %c0_23 = arith.constant 0 : index
    %49 = vector.load %arg8[%c0_22, %c0_23] : memref<16x128xf32, #tpu.memory_space<vmem>>, vector<16x128xf32>
    tpu.vector_store %arg8[%c0_22, %c0_23], %48 {strides = array<i32>} : memref<16x128xf32, #tpu.memory_space<vmem>>, vector<16x128xf32>,
    return
  }
  func.func @transform_0(%arg0: i32) -> (i32, i32) {
    %c0_i32 = arith.constant 0 : i32
    %c0_i32_0 = arith.constant 0 : i32
    return %arg0, %c0_i32 : i32, i32
  }
  func.func @transform_1(%arg0: i32) -> (i32, i32) {
    %c0_i32 = arith.constant 0 : i32
    %c0_i32_0 = arith.constant 0 : i32
    %c0_i32_1 = arith.constant 0 : i32
    return %c0_i32, %c0_i32_0 : i32, i32
  }
  func.func @transform_2(%arg0: i32) -> (i32, i32) {
    %c0_i32 = arith.constant 0 : i32
    %c0_i32_0 = arith.constant 0 : i32
    %c0_i32_1 = arith.constant 0 : i32
    return %c0_i32, %c0_i32_0 : i32, i32
  }
  func.func @transform_3(%arg0: i32) -> (i32, i32) {
    %c0_i32 = arith.constant 0 : i32
    %c0_i32_0 = arith.constant 0 : i32
    %c0_i32_1 = arith.constant 0 : i32
    return %c0_i32, %c0_i32_0 : i32, i32
  }
  func.func @transform_4(%arg0: i32) -> (i32, i32) {
    %c0_i32 = arith.constant 0 : i32
    %c0_i32_0 = arith.constant 0 : i32
    %c0_i32_1 = arith.constant 0 : i32
    return %c0_i32, %c0_i32_0 : i32, i32
  }
  func.func @transform_5(%arg0: i32) -> (i32, i32) {
    %c0_i32 = arith.constant 0 : i32
    %c0_i32_0 = arith.constant 0 : i32
    %c0_i32_1 = arith.constant 0 : i32
    return %c0_i32, %c0_i32_0 : i32, i32
  }
  func.func @transform_6(%arg0: i32) -> (i32, i32) {
    %c0_i32 = arith.constant 0 : i32
    %c0_i32_0 = arith.constant 0 : i32
    %c0_i32_1 = arith.constant 0 : i32
    return %c0_i32, %c0_i32_0 : i32, i32
  }
  func.func @transform_7(%arg0: i32) -> (i32, i32) {
    %c0_i32 = arith.constant 0 : i32
    %c0_i32_0 = arith.constant 0 : i32
    return %arg0, %c0_i32 : i32, i32
  }
}

</mosaic_0001>

<bundles_post_ra>
// kernel: tpu_custom_call.1
= control target key start
LH: loop header
LB: loop body
LE: loop exit
PB: predicated region body
PF: predicated region fallthrough
CT: control target
= control target key end

     0   :  { %12 = vsyncpa [#allocation3], 0  ;;  %s722_s0 = inlined_call_operand.hbm [shape: f32[16,128], index: 0, kind: input, shape index: {}]   ;;  %s723_s1 = inlined_call_operand.vmem [shape: f32[1,128], index: 1, kind: input, shape index: {}]   ;;  %s724_s2 = inlined_call_operand.vmem [shape: f32[1,128], index: 2, kind: input, shape index: {}]   ;;  %s725_s3 = inlined_call_operand.hbm [shape: bf16[128,128], index: 3, kind: input, shape index: {}]   ;;  %s726_s4 = inlined_call_operand.vmem [shape: f32[1,128], index: 4, kind: input, shape index: {}]   ;;  %s727_s5 = inlined_call_operand.hbm [shape: bf16[128,128], index: 5, kind: input, shape index: {}]   ;;  %s728_s6 = inlined_call_operand.vmem [shape: f32[1,128], index: 6, kind: input, shape index: {}]   ;;  %s729_s7 = inlined_call_operand.hbm [shape: f32[16,128], index: 7, kind: output, shape index: {}]  }
   0x1   :  { %13 = vsyncpa [#allocation6], 0 }
   0x2   :  { %14 = vsyncpa [#allocation4], 0  ;;  %s581_s24 = smov [#allocation5]   ;;  %s487_s28 = scalar_lea.hbm %s725_s3, 1024 }
   0x3   :  { %s36_s25 = sshll.u32 %s581_s24, 4  ;;  %p488_p0 = scmp.ne.s32.totalorder %s725_s3, %s487_s28  ;;  %s37_s25 = int_to_ptr.vmem [resolvable:$true] %s36_s25 }
   0x4   :  { %p491_p1 = scmp.lt.u32.totalorder %s487_s28, %s725_s3 }
   0x6   :  { %p493_p2 = pnand %p491_p1, %p488_p0 }
   0x8   :  { %496 = shalt.err (!%p493_p2)
}
   0x9   :  { %s497_s10 = scalar_lea.vmem %s37_s25, 1024  ;;  %p502_p4 = scmp.lt.s32.totalorder %s37_s25, %s37_s25 }
   0xa   :  { %p498_p3 = scmp.ne.s32.totalorder %s37_s25, %s497_s10  ;;  %p503_p5 = scmp.lt.s32.totalorder %s497_s10, %s497_s10 }
   0xc   :  { %p504_p6 = por %p503_p5, %p502_p4 }
   0xe   :  { %p505_p7 = pnand %p504_p6, %p498_p3 }
  0x10   :  { %508 = shalt.err (!%p505_p7)
}
  0x11   :  { %s582_s11 = smov 64   ;;  %s583_s12 = smov 4  }
  0x12   :  { %42 = dma.hbm_to_vmem [thread:$0]  %s725_s3, 1024, %s37_s25, [#allocation6], %s582_s11, %s582_s11, %s583_s12  }
  0x13   :  { %s584_s15 = smov [#allocation2]   ;;  %s509_s19 = scalar_lea.hbm %s722_s0, 256 }
  0x14   :  { %s20_s16 = sshll.u32 %s584_s15, 4  ;;  %p510_p8 = scmp.ne.s32.totalorder %s722_s0, %s509_s19  ;;  %s21_s16 = int_to_ptr.vmem [resolvable:$true] %s20_s16 }
  0x15   :  { %p513_p9 = scmp.lt.u32.totalorder %s509_s19, %s722_s0 }
  0x17   :  { %p515_p10 = pnand %p513_p9, %p510_p8 }
  0x19   :  { %518 = shalt.err (!%p515_p10)
}
  0x1a   :  { %s519_s24 = scalar_lea.vmem %s21_s16, 256  ;;  %p524_p12 = scmp.lt.s32.totalorder %s21_s16, %s21_s16 }
  0x1b   :  { %p520_p11 = scmp.ne.s32.totalorder %s21_s16, %s519_s24  ;;  %p525_p13 = scmp.lt.s32.totalorder %s519_s24, %s519_s24 }
  0x1d   :  { %p526_p0 = por %p525_p13, %p524_p12 }
  0x1f   :  { %p527_p1 = pnand %p526_p0, %p520_p11 }
  0x21   :  { %530 = shalt.err (!%p527_p1)
}
  0x22   :  { %s585_s3 = smov 128   ;;  %s586_s25 = smov 8  }
  0x23   :  { %26 = dma.hbm_to_vmem [thread:$0]  %s722_s0, 256, %s21_s16, [#allocation3], %s585_s3, %s585_s3, %s586_s25  }
  0x24   :  { %s587_s28 = smov [#allocation7]   ;;  %s531_s9 = scalar_lea.hbm %s727_s5, 1024 }
  0x25   :  { %s50_s29 = sshll.u32 %s587_s28, 4  ;;  %p532_p2 = scmp.ne.s32.totalorder %s727_s5, %s531_s9  ;;  %s51_s29 = int_to_ptr.vmem [resolvable:$true] %s50_s29 }
  0x26   :  { %p535_p3 = scmp.lt.u32.totalorder %s531_s9, %s727_s5 }
  0x28   :  { %p537_p4 = pnand %p535_p3, %p532_p2 }
  0x2a   :  { %540 = shalt.err (!%p537_p4)
}
  0x2b   :  { %s541_s17 = scalar_lea.vmem %s51_s29, 1024  ;;  %p546_p6 = scmp.lt.s32.totalorder %s51_s29, %s51_s29 }
  0x2c   :  { %p542_p5 = scmp.ne.s32.totalorder %s51_s29, %s541_s17  ;;  %p547_p7 = scmp.lt.s32.totalorder %s541_s17, %s541_s17 }
  0x2e   :  { %p548_p8 = por %p547_p7, %p546_p6 }
  0x30   :  { %p549_p9 = pnand %p548_p8, %p542_p5 }
  0x32   :  { %552 = shalt.err (!%p549_p9)
}
  0x33   :  { %56 = dma.hbm_to_vmem [thread:$0]  %s727_s5, 1024, %s51_s29, [#allocation6], %s582_s11, %s582_s11, %s583_s12  }
  0x34   :  { %575 = dma.done.wait [#allocation3], 256  }
  0x35   :  { %576 = vsyncadd [#allocation3], 4294967040 }
  0x36   :  { %577 = dma.done.wait [#allocation6], 2048  }
  0x37   :  { %578 = vsyncadd [#allocation6], 4294965248  ;;  %v69_v0 = vld [vmem:[#allocation2] sm:$0xff]  ;;  %v70_v1 = vld [vmem:[#allocation2 + $0x8] sm:$0xff]  ;;  %v588_v2 = vmov 0.0   ;;  %v71_v4 = vlaneseq  ;;  %vm589_vm1 = vmmov 0  }
  0x38   :  { %76 = vadd.xlane.f32.xlu0 %v69_v0  ;;  %413 = vmatprep.subr.bf16.mxu0 %v588_v2  ;;  %v463_v3 = vld [vmem:[#allocation5] sm:$0xff]   ;;  %v464_v17 = vld [vmem:[#allocation5 + $0x8] sm:$0xff]   ;;  %v465_v18 = vld [vmem:[#allocation5 + $0x10] sm:$0xff]   ;;  %s590_s20 = smov [#allocation8]  }
  0x39   :  { %433 = vmatprep.subr.bf16.mxu1 %v588_v2  ;;  %414 = vmatpush3.bf16.msra.mxu0 %v463_v3  ;;  %v72_v5 = vand.u32 127, %v71_v4  ;;  %v466_v19 = vld [vmem:[#allocation5 + $0x18] sm:$0xff]   ;;  %v467_v20 = vld [vmem:[#allocation5 + $0x20] sm:$0xff]   ;;  %v468_v21 = vld [vmem:[#allocation5 + $0x28] sm:$0xff]   ;;  %s361_s21 = sshll.u32 %s590_s20, 4  ;;  %s362_s21 = int_to_ptr.vmem [resolvable:$true] %s361_s21 }
  0x3a   :  { %415 = vmatprep.subr.bf16.mxu0 %v588_v2  ;;  %429 = vmatprep.mubr.msk.bf16.mxu0 %vm589_vm1, %v588_v2  ;;  %v469_v22 = vld [vmem:[#allocation5 + $0x30] sm:$0xff]   ;;  %v470_v23 = vld [vmem:[#allocation5 + $0x38] sm:$0xff]   ;;  %v471_v24 = vld [vmem:[#allocation7] sm:$0xff]   ;;  %s553_s22 = scalar_lea.vmem %s362_s21, 256  ;;  %p558_p11 = scmp.lt.s32.totalorder %s362_s21, %s362_s21 }
  0x3b   :  { %vm73_vm0 = vcmp.lt.s32.totalorder %v72_v5, 32  ;;  %449 = vmatprep.mubr.msk.bf16.mxu1 %vm589_vm1, %v588_v2  ;;  %434 = vmatpush3.bf16.msra.mxu1 %v471_v24  ;;  %v472_v25 = vld [vmem:[#allocation7 + $0x8] sm:$0xff]   ;;  %v375_v34 = vld [vmem:[%s723_s1] ss:$0 sm:$0xff]  ;;  %v474_v44 = vld [vmem:[#allocation7 + $0x18] sm:$0xff]   ;;  %p554_p10 = scmp.ne.s32.totalorder %s362_s21, %s553_s22  ;;  %p559_p12 = scmp.lt.s32.totalorder %s553_s22, %s553_s22 }
  0x3c   :  { %78 = vadd.xlane.f32.xlu0 %v70_v1  ;;  %v374_v8 = vsel %vm73_vm0, 1.0, %v588_v2  ;;  %435 = vmatprep.subr.bf16.mxu1 %v588_v2  ;;  %v376_v38 = vld [vmem:[%s724_s2] ss:$0 sm:$0xff]  ;;  %v475_v45 = vld [vmem:[#allocation7 + $0x20] sm:$0xff]   ;;  %v476_v46 = vld [vmem:[#allocation7 + $0x28] sm:$0xff]  }
  0x3d   :  { %416 = vmatpush3.bf16.msra.mxu0 %v464_v17  ;;  %v473_v43 = vld [vmem:[#allocation7 + $0x10] sm:$0xff]   ;;  %v478_v48 = vld [vmem:[#allocation7 + $0x38] sm:$0xff]   ;;  %p560_p13 = por %p559_p12, %p558_p11 }
  0x3e   :  { %417 = vmatprep.subr.bf16.mxu0 %v588_v2  ;;  %v477_v47 = vld [vmem:[#allocation7 + $0x30] sm:$0xff]  }
  0x3f   :  { %436 = vmatpush3.bf16.msra.mxu1 %v472_v25  ;;  %v377_v49 = vld [vmem:[%s726_s4] ss:$0 sm:$0xff]  ;;  %p561_p0 = pnand %p560_p13, %p554_p10 }
  0x40   :  { %437 = vmatprep.subr.bf16.mxu1 %v588_v2  ;;  %v386_v3 = vld [vmem:[%s728_s6] ss:$0 sm:$0xff] }
  0x41   :  { %418 = vmatpush3.bf16.msra.mxu0 %v465_v18 }
  0x42   :  { %419 = vmatprep.subr.bf16.mxu0 %v588_v2 }
  0x43   :  { %438 = vmatpush3.bf16.msra.mxu1 %v473_v43 }
  0x44   :  { %439 = vmatprep.subr.bf16.mxu1 %v588_v2 }
  0x45   :  { %420 = vmatpush3.bf16.msra.mxu0 %v466_v19 }
  0x46   :  { %421 = vmatprep.subr.bf16.mxu0 %v588_v2 }
  0x47   :  { %440 = vmatpush3.bf16.msra.mxu1 %v474_v44 }
  0x48   :  { %441 = vmatprep.subr.bf16.mxu1 %v588_v2 }
  0x49   :  { %422 = vmatpush3.bf16.msra.mxu0 %v467_v20 }
  0x4a   :  { %423 = vmatprep.subr.bf16.mxu0 %v588_v2 }
  0x4b   :  { %442 = vmatpush3.bf16.msra.mxu1 %v475_v45 }
  0x4c   :  { %443 = vmatprep.subr.bf16.mxu1 %v588_v2 }
  0x4d   :  { %424 = vmatpush3.bf16.msra.mxu0 %v468_v21 }
  0x4e   :  { %425 = vmatprep.subr.bf16.mxu0 %v588_v2 }
  0x4f   :  { %444 = vmatpush3.bf16.msra.mxu1 %v476_v46 }
  0x50   :  { %445 = vmatprep.subr.bf16.mxu1 %v588_v2 }
  0x51   :  { %426 = vmatpush3.bf16.msra.mxu0 %v469_v22 }
  0x52   :  { %427 = vmatprep.subr.bf16.mxu0 %v588_v2 }
  0x53   :  { %446 = vmatpush3.bf16.msra.mxu1 %v477_v47 }
  0x54   :  { %447 = vmatprep.subr.bf16.mxu1 %v588_v2 }
  0x55   :  { %428 = vmatpush3.bf16.msra.mxu0 %v470_v23 }
  0x57   :  { %448 = vmatpush3.bf16.msra.mxu1 %v478_v48 }
  0xc5   :  { %v77_v6 = vpop.xlane.xlu0 %76 }
  0xc6   :  { %v80_v7 = vmul.f32 0.03125, %v77_v6 }
  0xc8   :  { %v82_v9 = vsub.f32 %v69_v0, %v80_v7 }
  0xc9   :  { %v79_v10 = vpop.xlane.xlu0 %78 }
  0xca   :  { %v81_v11 = vmul.f32 0.03125, %v79_v10  ;;  %v84_v12 = vmul.f32 %v374_v8, %v82_v9 }
  0xcc   :  { %v83_v13 = vsub.f32 %v70_v1, %v81_v11  ;;  %v86_v14 = vmul.f32 %v84_v12, %v84_v12 }
  0xce   :  { %88 = vadd.xlane.f32.xlu1 %v86_v14  ;;  %v85_v15 = vmul.f32 %v374_v8, %v83_v13 }
  0xd0   :  { %v87_v16 = vmul.f32 %v85_v15, %v85_v15 }
  0xd2   :  { %90 = vadd.xlane.f32.xlu1 %v87_v16 }
 0x15b   :  { %v89_v26 = vpop.xlane.xlu1 %88 }
 0x15c   :  { %v92_v27 = vmul.f32 0.03125, %v89_v26 }
 0x15e   :  { %v94_v28 = vadd.f32 1e-05, %v92_v27 }
 0x15f   :  { %v91_v29 = vpop.xlane.xlu1 %90 }
 0x160   :  { %479 = vrsqrt.f32 %v94_v28  ;;  %v93_v30 = vmul.f32 0.03125, %v91_v29 }
 0x162   :  { %v95_v31 = vadd.f32 1e-05, %v93_v30 }
 0x164   :  { %481 = vrsqrt.f32 %v95_v31 }
 0x16a   :  { %v480_v32 = vpop.eup %479 }
 0x16b   :  { %v98_v33 = vmul.f32 %v480_v32, %v84_v12 }
 0x16d   :  { %v107_v37 = vmul.f32 %v375_v34, %v98_v33 }
 0x16e   :  { %v482_v35 = vpop.eup %481 }
 0x16f   :  { %v99_v36 = vmul.f32 %v482_v35, %v85_v15  ;;  %v116_v40 = vadd.f32 %v376_v38, %v107_v37 }
 0x171   :  { %v108_v39 = vmul.f32 %v375_v34, %v99_v36 }
 0x173   :  { %v117_v41 = vadd.f32 %v376_v38, %v108_v39 }
 0x175   :  { %v118_v42 = vpack.c.bf16 %v117_v41, %v116_v40 }
 0x177   :  { %430 = vmatmul.mubr.bf16.vlgmr.msra.gmra.mrb[0].mxu0 %v118_v42 }
 0x24a   :  { %v224_v50 = vpop.f32.mrb[0].mxu0 }
 0x24b   :  { %v225_v51 = vadd.f32 %v377_v49, %v224_v50  ;;  %v431_v52 = vpop.f32.mrb[1].mxu0 }
 0x24c   :  { %v227_v53 = vpop.f32.mrb[2].mxu0 }
 0x24d   :  { %v233_v54 = vmul.f32 0.70710677, %v225_v51  ;;  %v228_v55 = vadd.f32 %v377_v49, %v227_v53  ;;  %v432_v56 = vpop.f32.mrb[3].mxu0  ;;  %v231_v61 = vmul.f32 0.5, %v225_v51 }
 0x24f   :  { %483 = verf.f32 %v233_v54  ;;  %v234_v57 = vmul.f32 0.70710677, %v228_v55  ;;  %v232_v62 = vmul.f32 0.5, %v228_v55 }
 0x251   :  { %485 = verf.f32 %v234_v57 }
 0x259   :  { %v484_v58 = vpop.eup %483 }
 0x25a   :  { %v237_v59 = vadd.f32 1.0, %v484_v58 }
 0x25b   :  { %v486_v60 = vpop.eup %485 }
 0x25c   :  { %v238_v63 = vadd.f32 1.0, %v486_v60  ;;  %v239_v0 = vmul.f32 %v237_v59, %v231_v61 }
 0x25e   :  { %v240_v1 = vmul.f32 %v238_v63, %v232_v62 }
 0x260   :  { %v241_v2 = vpack.c.bf16 %v240_v1, %v239_v0 }
 0x262   :  { %450 = vmatmul.mubr.bf16.vlgmr.msra.gmra.mrb[0].mxu1 %v241_v2 }
 0x335   :  { %v347_v4 = vpop.f32.mrb[0].mxu1 }
 0x336   :  { %v348_v5 = vadd.f32 %v386_v3, %v347_v4  ;;  %v451_v6 = vpop.f32.mrb[1].mxu1 }
 0x337   :  { %v350_v7 = vpop.f32.mrb[2].mxu1 }
 0x338   :  { %354 = vst [vmem:[#allocation8] sm:$0xff] %v348_v5  ;;  %v351_v8 = vadd.f32 %v386_v3, %v350_v7  ;;  %v452_v9 = vpop.f32.mrb[3].mxu1 }
 0x33a   :  { %355 = vst [vmem:[#allocation8 + $0x8] sm:$0xff] %v351_v8 }
 0x33b   :  { %564 = shalt.err (!%p561_p0)
}
 0x33c   :  { %s565_s24 = scalar_lea.hbm %s729_s7, 256 }
 0x33d   :  { %p566_p1 = scmp.ne.s32.totalorder %s729_s7, %s565_s24  ;;  %p569_p2 = scmp.lt.u32.totalorder %s565_s24, %s729_s7 }
 0x33f   :  { %p571_p3 = pnand %p569_p2, %p566_p1 }
 0x341   :  { %574 = shalt.err (!%p571_p3)
}
 0x342   :  { %367 = dma.vmem_to_hbm [thread:$0]  %s362_s21, 256, %s729_s7, [#allocation4], %s585_s3, %s585_s3, %s586_s25  }
 0x343   :  { %579 = dma.done.wait [#allocation4], 256  }
 0x344   :  { %580 = vsyncadd [#allocation4], 4294967040 }
 0x345   :  { %371 = vsyncpa [#allocation3], 1 }
 0x346   :  { %372 = vsyncpa [#allocation6], 1 }
 0x347   :  { %373 = vsyncpa [#allocation4], 1 }

</bundles_post_ra>
